<compile_context>
chip_gen: v6e
topology: v6e:2x2x1
jax: 0.10.0
libtpu: 0.0.40
codegen_flags: <defaults>
</compile_context>

<pallas_src>
import functools

import jax
import jax.numpy as jnp
import numpy as np
from jax.experimental import pallas as pl
from jax.experimental.pallas import tpu as pltpu

C1, C5, C3, CP = 16, 24, 24, 24
C_OUT = C1 + C5 + C3 + CP  # 88


# ----------------------------------------------------------------------------
# One-time probe: which way does pltpu.roll rotate?  (out[i] = in[i - shift]
# like jnp.roll, or the opposite.)  Resolved once, then baked in statically.
# ----------------------------------------------------------------------------
def _roll_probe_kernel(x_ref, o_ref):
    o_ref[...] = pltpu.roll(x_ref[...], shift=1, axis=1)


@functools.lru_cache(maxsize=None)
def _roll_matches_jnp():
    x = jnp.broadcast_to(jnp.arange(128, dtype=jnp.float32), (8, 128))
    y = pl.pallas_call(
        _roll_probe_kernel,
        out_shape=jax.ShapeDtypeStruct((8, 128), jnp.float32))(x)
    v = float(jax.device_get(y)[0, 0])
    if v == 127.0:      # jnp.roll convention: out[i] = in[i - shift]
        return True
    if v == 1.0:        # opposite convention: out[i] = in[i + shift]
        return False
    raise RuntimeError(f"unexpected pltpu.roll behaviour (probe value {v})")


# ----------------------------------------------------------------------------
# Fused Pallas kernel: everything is (channels, lanes), lanes = imgs*H*W.
# ----------------------------------------------------------------------------
def _inception_a_kernel(x_ref, row_ref, col_ref, w1_ref, bh_ref,
                        w5_ref, b5_ref, w3a_ref, b3a_ref, w3b_ref, b3b_ref,
                        bp_ref, o_ref, *, H, W, roll_fwd):
    """x:(Cin,L)  row/col:(1,L) int32 (pixel coords inside its image)
    w1:(72,Cin)  bh:(48,1)  w5:(24,400)  w3a:(24,144)  w3b:(24,216)
    b*: (24,1)   o:(88,L)."""
    f32 = jnp.float32
    L = x_ref.shape[1]

    x = x_ref[...]                                               # (Cin, L)
    row = row_ref[...]                                           # (1, L)
    col = col_ref[...]                                           # (1, L)

    # ---- all four 1x1 convs on x fused into ONE MXU matmul (Cout = 72) ----
    y_all = jnp.dot(w1_ref[...], x, preferred_element_type=f32)  # (72, L)
    y_head = y_all[0:48] + bh_ref[...]                           # biased (first 3)
    y_1x1 = y_head[0:16]                                         # branch1x1 done
    y_5in = y_head[16:32]                                        # -> 5x5 conv
    y_3in = y_head[32:48]                                        # -> 3x3 convs
    y_pool = y_all[48:72]                                        # pool 1x1 (bias later)

    def shifted(y, dy, dx):
        """y at pixel (h+dy, w+dx) of the SAME image, zero outside it.
        The pixel axis is flat in lanes, so the shift is a lane roll by
        dy*W + dx; wrap-around / cross-image lanes are exactly the masked ones."""
        s = dy * W + dx
        if s != 0:
            amt = (-s if roll_fwd else s) % L                    # non-negative
            y = pltpu.roll(y, shift=amt, axis=1)
        ok = ((row >= -dy) & (row < H - dy) &
              (col >= -dx) & (col < W - dx))                     # (1, L) bool
        return jnp.where(ok, y, 0.0)

    def conv_same(y, w_ref, b_ref, K):
        """'same' KxK conv as ONE matmul: stack the K*K shifted windows along
        the contraction (sublane) axis and hit the MXU once."""
        p = K // 2
        taps = jnp.concatenate(
            [shifted(y, dy, dx)
             for dy in range(-p, p + 1) for dx in range(-p, p + 1)], axis=0)
        return jnp.dot(w_ref[...], taps, preferred_element_type=f32) + b_ref[...]

    # ---- branch 5x5 : 1x1 (done) -> 5x5 ----
    y5 = conv_same(y_5in, w5_ref, b5_ref, 5)                     # (24, L)

    # ---- branch 3x3 : 1x1 (done) -> 3x3 -> 3x3 ----
    m3 = conv_same(y_3in, w3a_ref, b3a_ref, 3)
    y3 = conv_same(m3, w3b_ref, b3b_ref, 3)

    # ---- branch pool : 3x3 avg-pool (count_include_pad=True -> /9) of the
    #      hoisted 1x1 conv output, then its bias (exact: both ops linear). ----
    pacc = jnp.zeros_like(y_pool)
    for dy in range(-1, 2):
        for dx in range(-1, 2):
            pacc = pacc + shifted(y_pool, dy, dx)
    yp = pacc * (1.0 / 9.0) + bp_ref[...]                        # (24, L)

    # ---- channel concat: four lane-dense, sublane-aligned stores ----
    o_ref[0:C1, :] = y_1x1.astype(o_ref.dtype)
    o_ref[C1:C1 + C5, :] = y5.astype(o_ref.dtype)
    o_ref[C1 + C5:C1 + C5 + C3, :] = y3.astype(o_ref.dtype)
    o_ref[C1 + C5 + C3:C_OUT, :] = yp.astype(o_ref.dtype)


# ----------------------------------------------------------------------------
# Wrapper: NCHW in -> NCHW out.  All layout plumbing is cheap XLA reshapes.
# ----------------------------------------------------------------------------
def inception_a(x_nchw, p, *, roll_fwd=True):
    N, Cin, H, W = x_nchw.shape
    HW = H * W

    # (Cin, N*H*W): channels in sublanes, pixels (image-major) in lanes.
    x2d = jnp.transpose(x_nchw, (1, 0, 2, 3)).reshape(Cin, N * HW)

    def w1x1(name):
        w, b = p[name]                                           # HWIO (1,1,Cin,Cout)
        return jnp.transpose(w[0, 0], (1, 0)), b                 # (Cout,Cin), (Cout,)

    w_11, b_11 = w1x1("branch1x1")
    w_51, b_51 = w1x1("branch5x5_1")
    w_31, b_31 = w1x1("branch3x3_1")
    w_p1, b_p1 = w1x1("branch_pool")

    w1 = jnp.concatenate([w_11, w_51, w_31, w_p1], axis=0)       # (72, Cin)
    bh = jnp.concatenate([b_11, b_51, b_31], axis=0)[:, None]    # (48, 1)

    def wflat(name):
        w, b = p[name]                                           # (K,K,Cin,Cout) HWIO
        K, _, C, Cout = w.shape
        # row index of the flattened contraction = (kh*K + kw)*C + ci, which
        # matches the tap-stacking order inside the kernel.
        return jnp.transpose(w.reshape(K * K * C, Cout), (1, 0)), b[:, None]

    w5f, b5 = wflat("branch5x5_2")       # (24, 400), (24, 1)
    w3af, b3a = wflat("branch3x3_2")     # (24, 144), (24, 1)
    w3bf, b3b = wflat("branch3x3_3")     # (24, 216), (24, 1)
    bp = b_p1[:, None]                   # (24, 1)  added after the avg-pool

    # Per-pixel (row, col) inside its image -> halo masks without in-kernel div.
    ids = np.arange(HW, dtype=np.int32)
    row_ids = jnp.asarray(np.tile((ids // W).astype(np.int32)[None, :], (1, N)))
    col_ids = jnp.asarray(np.tile((ids % W).astype(np.int32)[None, :], (1, N)))

    # Images folded into the lane axis per grid step: biggest divisor of N that
    # keeps >= 2 grid steps when N >= 2 (feed both v7x TensorCores) and keeps
    # the lane extent modest (VMEM headroom).  lanes is a multiple of 128 here
    # (HW = 256); for other HW the stores are masked but still correct.
    max_imgs = max(1, 1024 // HW)
    imgs_per_step = 1
    for cand in range(1, min(N, max_imgs) + 1):
        if N % cand == 0 and (N // cand >= 2 or N == 1):
            imgs_per_step = cand
    lanes = imgs_per_step * HW
    grid = (N // imgs_per_step,)

    kernel = functools.partial(_inception_a_kernel, H=H, W=W, roll_fwd=roll_fwd)
    out2d = pl.pallas_call(
        kernel,
        out_shape=jax.ShapeDtypeStruct((C_OUT, N * HW), x_nchw.dtype),
        grid=grid,
        in_specs=[
            pl.BlockSpec((Cin, lanes), lambda g: (0, g)),
            pl.BlockSpec((1, lanes), lambda g: (0, g)),
            pl.BlockSpec((1, lanes), lambda g: (0, g)),
            pl.BlockSpec(w1.shape, lambda g: (0, 0)),
            pl.BlockSpec(bh.shape, lambda g: (0, 0)),
            pl.BlockSpec(w5f.shape, lambda g: (0, 0)),
            pl.BlockSpec(b5.shape, lambda g: (0, 0)),
            pl.BlockSpec(w3af.shape, lambda g: (0, 0)),
            pl.BlockSpec(b3a.shape, lambda g: (0, 0)),
            pl.BlockSpec(w3bf.shape, lambda g: (0, 0)),
            pl.BlockSpec(b3b.shape, lambda g: (0, 0)),
            pl.BlockSpec(bp.shape, lambda g: (0, 0)),
        ],
        out_specs=pl.BlockSpec((C_OUT, lanes), lambda g: (0, g)),
        compiler_params=pltpu.CompilerParams(
            dimension_semantics=("parallel",)),
    )(x2d, row_ids, col_ids, w1, bh, w5f, b5, w3af, b3a, w3bf, b3b, bp)

    return jnp.transpose(out2d.reshape(C_OUT, N, H, W), (1, 0, 2, 3))


# ----------------------------------------------------------------------------
# Deterministic parameter init (mirrors nn.Conv2d default init bounds), HWIO.
# ----------------------------------------------------------------------------
def init_conv(key, kh, kw, cin, cout):
    kw_key, kb_key = jax.random.split(key)
    bound = 1.0 / np.sqrt(cin * kh * kw)
    w = jax.random.uniform(kw_key, (kh, kw, cin, cout), jnp.float32, -bound, bound)
    b = jax.random.uniform(kb_key, (cout,), jnp.float32, -bound, bound)
    return w, b


def make_params(key, in_channels):
    keys = jax.random.split(key, 7)
    return {
        "branch1x1":   init_conv(keys[0], 1, 1, in_channels, 16),
        "branch5x5_1": init_conv(keys[1], 1, 1, in_channels, 16),
        "branch5x5_2": init_conv(keys[2], 5, 5, 16, 24),
        "branch3x3_1": init_conv(keys[3], 1, 1, in_channels, 16),
        "branch3x3_2": init_conv(keys[4], 3, 3, 16, 24),
        "branch3x3_3": init_conv(keys[5], 3, 3, 24, 24),
        "branch_pool": init_conv(keys[6], 1, 1, in_channels, 24),
    }


# ----------------------------------------------------------------------------
# Pure-JAX reference (for correctness check)
# ----------------------------------------------------------------------------
def _ref_conv(x, w, b):
    kh, kw = w.shape[0], w.shape[1]
    y = jax.lax.conv_general_dilated(
        x, w, window_strides=(1, 1),
        padding=((kh // 2, kh // 2), (kw // 2, kw // 2)),
        dimension_numbers=("NHWC", "HWIO", "NHWC"))
    return y + b


def ref_inception_a(x_nchw, p):
    x = jnp.transpose(x_nchw, (0, 2, 3, 1))
    b1 = _ref_conv(x, *p["branch1x1"])
    b5 = _ref_conv(_ref_conv(x, *p["branch5x5_1"]), *p["branch5x5_2"])
    b3 = _ref_conv(_ref_conv(_ref_conv(x, *p["branch3x3_1"]),
                             *p["branch3x3_2"]), *p["branch3x3_3"])
    pool = jax.lax.reduce_window(
        x, 0.0, jax.lax.add, (1, 3, 3, 1), (1, 1, 1, 1),
        padding=((0, 0), (1, 1), (1, 1), (0, 0))) / 9.0
    bp = _ref_conv(pool, *p["branch_pool"])
    out = jnp.concatenate([b1, b5, b3, bp], axis=-1)
    return jnp.transpose(out, (0, 3, 1, 2))


# ----------------------------------------------------------------------------
if __name__ == "__main__":
    key = jax.random.PRNGKey(0)
    k_x, k_p = jax.random.split(key)

    N, C_in, H, W = 2, 4, 16, 16
    x = jax.random.normal(k_x, (N, C_in, H, W), jnp.float32)    # NCHW like PyTorch
    params = make_params(k_p, C_in)

    roll_fwd = _roll_matches_jnp()                              # eager, outside jit
    fwd = jax.jit(functools.partial(inception_a, roll_fwd=roll_fwd))
    out = jax.block_until_ready(fwd(x, params))

    assert out.shape == (N, C_OUT, H, W), out.shape

    ref = jax.block_until_ready(ref_inception_a(x, params))
    np.testing.assert_allclose(np.asarray(out), np.asarray(ref),
                               atol=1e-4, rtol=1e-4)

    print("KERNEL_OK")
</pallas_src>

<mosaic_0001>
module attributes {stable_mosaic.version = 11 : i64} {
  func.func @_roll_probe_kernel(%arg0: memref<8x128xf32, #tpu.memory_space<vmem>>, %arg1: memref<8x128xf32, #tpu.memory_space<vmem>>) attributes {dimension_semantics = [], scalar_prefetch = 0 : i64, scratch_operands = 0 : i64, tpu.core_type = #tpu.core_type<tc>} {
    %c0 = arith.constant 0 : index
    %c0_0 = arith.constant 0 : index
    %0 = vector.load %arg0[%c0, %c0_0] : memref<8x128xf32, #tpu.memory_space<vmem>>, vector<8x128xf32>
    %c1_i32 = arith.constant 1 : i32
    %1 = tpu.dynamic_rotate %0 by %c1_i32 dim 1 : vector<8x128xf32>, i32 -> vector<8x128xf32>
    %c0_1 = arith.constant 0 : index
    %c0_2 = arith.constant 0 : index
    %2 = vector.load %arg1[%c0_1, %c0_2] : memref<8x128xf32, #tpu.memory_space<vmem>>, vector<8x128xf32>
    tpu.vector_store %arg1[%c0_1, %c0_2], %1 {strides = array<i32>} : memref<8x128xf32, #tpu.memory_space<vmem>>, vector<8x128xf32>,
    return
  }
}

</mosaic_0001>

<bundles_post_ra>
// kernel: tpu_custom_call.1
= control target key start
LH: loop header
LB: loop body
LE: loop exit
PB: predicated region body
PF: predicated region fallthrough
CT: control target
= control target key end

     0   :  { %6 = vsyncpa [#allocation3], 0  ;;  %s106_s0 = inlined_call_operand.hbm [shape: f32[8,128], index: 0, kind: input, shape index: {}]   ;;  %s107_s1 = inlined_call_operand.hbm [shape: f32[8,128], index: 1, kind: output, shape index: {}]  }
   0x1   :  { %7 = vsyncpa [#allocation4], 0  ;;  %s87_s6 = smov [#allocation2]  }
   0x2   :  { %s14_s7 = sshll.u32 %s87_s6, 4  ;;  %s15_s7 = int_to_ptr.vmem [resolvable:$true] %s14_s7 }
   0x3   :  { %s51_s8 = scalar_lea.vmem %s15_s7, 128  ;;  %p56_p1 = scmp.lt.s32.totalorder %s15_s7, %s15_s7 }
   0x4   :  { %p52_p0 = scmp.ne.s32.totalorder %s15_s7, %s51_s8  ;;  %p57_p2 = scmp.lt.s32.totalorder %s51_s8, %s51_s8 }
   0x6   :  { %p58_p3 = por %p57_p2, %p56_p1 }
   0x8   :  { %p59_p4 = pnand %p58_p3, %p52_p0 }
   0xa   :  { %62 = shalt.err (!%p59_p4)
}
   0xb   :  { %17 = dma.hbm_to_vmem [thread:$0]  %s106_s0, 128, %s15_s7, [#allocation3]  }
   0xc   :  { %83 = dma.done.wait [#allocation3], 128  }
   0xd   :  { %84 = vsyncadd [#allocation3], 4294967168  ;;  %v21_v0 = vld [vmem:[#allocation2] sm:$0xff]  ;;  %s88_s11 = smov 1   ;;  %s89_s12 = smov [#allocation5]  }
   0xe   :  { %22 = vrot.lane.b32.xlu0 %v21_v0, %s88_s11  ;;  %s31_s13 = sshll.u32 %s89_s12, 4  ;;  %s32_s13 = int_to_ptr.vmem [resolvable:$true] %s31_s13 }
   0xf   :  { %s63_s14 = scalar_lea.vmem %s32_s13, 128  ;;  %p68_p6 = scmp.lt.s32.totalorder %s32_s13, %s32_s13 }
  0x10   :  { %p64_p5 = scmp.ne.s32.totalorder %s32_s13, %s63_s14  ;;  %p69_p7 = scmp.lt.s32.totalorder %s63_s14, %s63_s14 }
  0x12   :  { %p70_p8 = por %p69_p7, %p68_p6 }
  0x14   :  { %p71_p9 = pnand %p70_p8, %p64_p5 }
  0x80   :  { %v23_v1 = vpop.permute.xlu0 %22 }
  0x81   :  { %24 = vst [vmem:[#allocation5] sm:$0xff] %v23_v1 }
  0x82   :  { %74 = shalt.err (!%p71_p9)
}
  0x83   :  { %34 = dma.vmem_to_hbm [thread:$0]  %s32_s13, 128, %s107_s1, [#allocation4]  }
  0x84   :  { %85 = dma.done.wait [#allocation4], 128  }
  0x85   :  { %86 = vsyncadd [#allocation4], 4294967168 }
  0x86   :  { %38 = vsyncpa [#allocation3], 1 }
  0x87   :  { %39 = vsyncpa [#allocation4], 1 }

</bundles_post_ra>
